<compile_context>
chip_gen: v7x
topology: tpu7x:2x2x1
jax: 0.10.0
libtpu: 0.0.40
codegen_flags: <defaults>
</compile_context>

<pallas_src>
import functools

import jax
import jax.numpy as jnp
from jax.experimental import pallas as pl
from jax.experimental.pallas import tpu as pltpu

_LANE = 128
_DEFAULT_TILE_ROWS = 2048   # 2048 * 128 * 12 B = 3 MiB of f32 input per step


def _num_tensorcores():
    """2 only on chips where a 'parallel' grid axis is sharded across 2 TCs."""
    try:
        kind = jax.devices()[0].device_kind.lower()
    except Exception:  # pragma: no cover - defensive
        return 1
    if ("v7" in kind) or ("v4" in kind) or ("v5p" in kind):
        return 2
    return 1


def _as_compute_dtype(x):
    # Stream f32 / bf16 at native width (upcast happens in-kernel); everything
    # else is converted to f32 up front.
    if x.dtype == jnp.float32 or x.dtype == jnp.bfloat16:
        return x
    return x.astype(jnp.float32)


def _sq_hinge_kernel(pred_ref, lh_ref, out_ref, *, margin, full_rows, rem,
                     t_rows, tiles_per_core):
    c = pl.program_id(0)          # core-split axis ("parallel")
    i = pl.program_id(1)          # reduction axis ("arbitrary")

    @pl.when(i == 0)
    def _init():
        out_ref[...] = jnp.zeros_like(out_ref)

    p = pred_ref[...].astype(jnp.float32)     # (t_rows, 128)
    lo = lh_ref[0].astype(jnp.float32)        # (t_rows, 128)
    hi = lh_ref[1].astype(jnp.float32)        # (t_rows, 128)
    m = jnp.float32(margin)
    loss = jnp.maximum(lo - p + m, 0.0) + jnp.maximum(p - hi + m, 0.0)
    sq = loss * loss

    def _accum(v):
        # Sublane reduction: mostly cheap VPU vreg-adds, one XLU reduce at the
        # end, accumulated straight into the resident output block.
        if t_rows % 8 == 0 and t_rows >= 8:
            v = v.reshape(t_rows // 8, 8, _LANE).sum(axis=0)      # (8, 128)
        out_ref[0] += jnp.sum(v, axis=0, keepdims=True)           # (1, 128)

    # Unclamped global tile index; >= num_tiles for clamped duplicate tiles.
    t = c * tiles_per_core + i
    # Tile is fully inside the valid range iff (t+1)*t_rows rows are all valid.
    needs_mask = (t + 1) * t_rows > full_rows

    @pl.when(jnp.logical_not(needs_mask))
    def _interior():                      # fast path: >95% of tiles, no mask
        _accum(sq)

    @pl.when(needs_mask)
    def _boundary():                      # ragged tail / clamped duplicates
        row = jax.lax.broadcasted_iota(jnp.int32, (t_rows, _LANE), 0)
        lane = jax.lax.broadcasted_iota(jnp.int32, (t_rows, _LANE), 1)
        grow = t * t_rows + row           # global row index (fits int32)
        valid = (grow < full_rows) | ((grow == full_rows) & (lane < rem))
        _accum(jnp.where(valid, sq, 0.0))


def squared_hinge_loss(predicted, y, margin=1.0, *, tile_rows=_DEFAULT_TILE_ROWS):
    """Pallas equivalent of SquaredHingeLoss(margin).forward(predicted, y)."""
    predicted = _as_compute_dtype(jnp.asarray(predicted)).reshape(-1)
    n = predicted.shape[0]
    if n == 0:
        # torch.mean over an empty tensor returns NaN.
        return jnp.float32(jnp.nan)
    y = _as_compute_dtype(jnp.asarray(y)).reshape(n, 2)

    # TODO(synk): eliminate this transpose by de-interleaving y in-kernel
    # (see header comment); kept for guaranteed lowering.
    lh = jnp.transpose(y)                                   # (2, N)

    rows = -(-n // _LANE)
    pad = rows * _LANE - n
    if pad:
        # TODO(synk): only hit when N % 128 != 0; masked in-kernel anyway.
        predicted = jnp.pad(predicted, (0, pad))
        lh = jnp.pad(lh, ((0, 0), (0, pad)))
    pred2 = predicted.reshape(rows, _LANE)
    lh3 = lh.reshape(2, rows, _LANE)

    t_rows = tile_rows if rows >= tile_rows else rows       # full-dim if tiny
    num_tiles = -(-rows // t_rows)
    n_cores = _num_tensorcores() if num_tiles >= 2 else 1
    tiles_per_core = -(-num_tiles // n_cores)
    full_rows, rem = divmod(n, _LANE)

    def _blk(c, i):
        # Clamp so DMAs never walk past the last block; duplicated blocks are
        # fully masked in-kernel via the unclamped tile index.
        return jnp.minimum(c * tiles_per_core + i, num_tiles - 1)

    kernel = functools.partial(
        _sq_hinge_kernel, margin=float(margin), full_rows=full_rows, rem=rem,
        t_rows=t_rows, tiles_per_core=tiles_per_core)

    in_bytes_per_step = t_rows * _LANE * (
        pred2.dtype.itemsize + 2 * lh3.dtype.itemsize)
    vmem_bytes = min(max(2 * in_bytes_per_step + (4 << 20), 16 << 20), 32 << 20)

    partials = pl.pallas_call(
        kernel,
        out_shape=jax.ShapeDtypeStruct((n_cores, 1, _LANE), jnp.float32),
        grid=(n_cores, tiles_per_core),
        in_specs=[
            pl.BlockSpec((t_rows, _LANE), lambda c, i: (_blk(c, i), 0)),
            pl.BlockSpec((2, t_rows, _LANE), lambda c, i: (0, _blk(c, i), 0)),
        ],
        out_specs=pl.BlockSpec((1, 1, _LANE), lambda c, i: (c, 0, 0)),
        compiler_params=pltpu.CompilerParams(
            dimension_semantics=("parallel", "arbitrary"),
            vmem_limit_bytes=vmem_bytes),
        cost_estimate=pl.CostEstimate(
            flops=9 * n, transcendentals=0,
            bytes_accessed=n * (pred2.dtype.itemsize + 2 * lh3.dtype.itemsize)
            + n_cores * _LANE * 4),
    )(pred2, lh3)

    # Single tiny cross-lane reduction over (n_cores, 1, 128) partial sums.
    return jnp.sum(partials) / jnp.float32(n)


def _reference(predicted, y, margin=1.0):
    low, high = y[:, 0], y[:, 1]
    loss_low = jnp.maximum(low - predicted + margin, 0.0)
    loss_high = jnp.maximum(predicted - high + margin, 0.0)
    loss = loss_low + loss_high
    return jnp.mean(jnp.square(loss))


if __name__ == "__main__":
    key = jax.random.PRNGKey(0)
    k1, k2, k3 = jax.random.split(key, 3)

    N = 256
    predicted = jax.random.normal(k1, (N,), dtype=jnp.float32)
    a = jax.random.normal(k2, (N,), dtype=jnp.float32)
    b = jax.random.normal(k3, (N,), dtype=jnp.float32)
    low = jnp.minimum(a, b)
    high = jnp.maximum(a, b)
    y = jnp.stack([low, high], axis=1)  # (N, 2)

    # Aligned case (N % 128 == 0) — exercises the unmasked fast path.
    out = jax.block_until_ready(squared_hinge_loss(predicted, y, margin=1.0))
    ref = _reference(predicted, y, margin=1.0)
    assert jnp.allclose(out, ref, rtol=1e-5, atol=1e-5), (out, ref)

    # Ragged case (N % 128 != 0) — exercises the masked boundary tile.
    N2 = 200
    out2 = jax.block_until_ready(
        squared_hinge_loss(predicted[:N2], y[:N2], margin=0.5))
    ref2 = _reference(predicted[:N2], y[:N2], margin=0.5)
    assert jnp.allclose(out2, ref2, rtol=1e-5, atol=1e-5), (out2, ref2)

    print("KERNEL_OK")
</pallas_src>

<mosaic_0001>
module attributes {stable_mosaic.version = 11 : i64} {
  func.func @_sq_hinge_kernel(%arg0: i32, %arg1: i32, %arg2: memref<2x128xf32, #tpu.memory_space<vmem>>, %arg3: memref<2x2x128xf32, #tpu.memory_space<vmem>>, %arg4: memref<1x1x128xf32, #tpu.memory_space<vmem>>) attributes {dimension_semantics = [#tpu.dimension_semantics<parallel>, #tpu.dimension_semantics<arbitrary>], iteration_bounds = array<i64: 1, 1>, scalar_prefetch = 0 : i64, scratch_operands = 0 : i64, tpu.core_type = #tpu.core_type<tc>, window_params = [{transform_indices = @transform_0, window_bounds = array<i64: 2, 128>}, {transform_indices = @transform_1, window_bounds = array<i64: 2, 2, 128>}, {transform_indices = @transform_2, window_bounds = array<i64: 1, 1, 128>}]} {
    %c0_i32 = arith.constant 0 : i32
    %0 = arith.cmpi eq, %arg1, %c0_i32 : i32
    %1 = arith.extui %0 : i1 to i32
    %c0_i32_0 = arith.constant 0 : i32
    %2 = arith.cmpi ne, %1, %c0_i32_0 : i32
    scf.if %2 {
      %cst_14 = arith.constant 0.000000e+00 : f32
      %30 = vector.broadcast %cst_14 : f32 to vector<1x1x128xf32>
      %c0_15 = arith.constant 0 : index
      %c0_16 = arith.constant 0 : index
      %c0_17 = arith.constant 0 : index
      %31 = vector.load %arg4[%c0_15, %c0_16, %c0_17] : memref<1x1x128xf32, #tpu.memory_space<vmem>>, vector<1x1x128xf32>
      tpu.vector_store %arg4[%c0_15, %c0_16, %c0_17], %30 {strides = array<i32>} : memref<1x1x128xf32, #tpu.memory_space<vmem>>, vector<1x1x128xf32>,
    } else {
    }
    %c0 = arith.constant 0 : index
    %c0_1 = arith.constant 0 : index
    %3 = vector.load %arg2[%c0, %c0_1] : memref<2x128xf32, #tpu.memory_space<vmem>>, vector<2x128xf32>
    %c0_2 = arith.constant 0 : index
    %c0_3 = arith.constant 0 : index
    %c0_4 = arith.constant 0 : index
    %4 = vector.load %arg3[%c0_2, %c0_3, %c0_4] : memref<2x2x128xf32, #tpu.memory_space<vmem>>, vector<1x2x128xf32>
    %5 = vector.shape_cast %4 : vector<1x2x128xf32> to vector<2x128xf32>
    %c1 = arith.constant 1 : index
    %c0_5 = arith.constant 0 : index
    %c0_6 = arith.constant 0 : index
    %6 = vector.load %arg3[%c1, %c0_5, %c0_6] : memref<2x2x128xf32, #tpu.memory_space<vmem>>, vector<1x2x128xf32>
    %7 = vector.shape_cast %6 : vector<1x2x128xf32> to vector<2x128xf32>
    %8 = arith.subf %5, %3 : vector<2x128xf32>
    %cst = arith.constant 1.000000e+00 : f32
    %9 = vector.broadcast %cst : f32 to vector<2x128xf32>
    %10 = arith.addf %8, %9 : vector<2x128xf32>
    %cst_7 = arith.constant 0.000000e+00 : f32
    %11 = vector.broadcast %cst_7 : f32 to vector<2x128xf32>
    %12 = arith.maximumf %10, %11 : vector<2x128xf32>
    %13 = arith.subf %3, %7 : vector<2x128xf32>
    %cst_8 = arith.constant 1.000000e+00 : f32
    %14 = vector.broadcast %cst_8 : f32 to vector<2x128xf32>
    %15 = arith.addf %13, %14 : vector<2x128xf32>
    %cst_9 = arith.constant 0.000000e+00 : f32
    %16 = vector.broadcast %cst_9 : f32 to vector<2x128xf32>
    %17 = arith.maximumf %15, %16 : vector<2x128xf32>
    %18 = arith.addf %12, %17 : vector<2x128xf32>
    %19 = arith.mulf %18, %18 : vector<2x128xf32>
    %c1_i32 = arith.constant 1 : i32
    %20 = arith.muli %arg0, %c1_i32 : i32
    %21 = arith.addi %20, %arg1 : i32
    %c1_i32_10 = arith.constant 1 : i32
    %22 = arith.addi %21, %c1_i32_10 : i32
    %c2_i32 = arith.constant 2 : i32
    %23 = arith.muli %22, %c2_i32 : i32
    %c2_i32_11 = arith.constant 2 : i32
    %24 = arith.cmpi sgt, %23, %c2_i32_11 : i32
    %true = arith.constant true
    %25 = arith.xori %24, %true : i1
    %26 = arith.extui %25 : i1 to i32
    %c0_i32_12 = arith.constant 0 : i32
    %27 = arith.cmpi ne, %26, %c0_i32_12 : i32
    scf.if %27 {
      %c0_14 = arith.constant 0 : index
      %c0_15 = arith.constant 0 : index
      %c0_16 = arith.constant 0 : index
      %30 = vector.load %arg4[%c0_14, %c0_15, %c0_16] : memref<1x1x128xf32, #tpu.memory_space<vmem>>, vector<1x1x128xf32>
      %31 = vector.shape_cast %30 : vector<1x1x128xf32> to vector<1x128xf32>
      %cst_17 = arith.constant dense<0.000000e+00> : vector<128xf32>
      %32 = vector.multi_reduction <add>, %19, %cst_17 [0] : vector<2x128xf32> to vector<128xf32>
      %33 = vector.shape_cast %32 : vector<128xf32> to vector<1x128xf32>
      %34 = arith.addf %31, %33 : vector<1x128xf32>
      %c0_18 = arith.constant 0 : index
      %c0_19 = arith.constant 0 : index
      %c0_20 = arith.constant 0 : index
      %35 = vector.load %arg4[%c0_18, %c0_19, %c0_20] : memref<1x1x128xf32, #tpu.memory_space<vmem>>, vector<1x1x128xf32>
      %36 = vector.shape_cast %35 : vector<1x1x128xf32> to vector<1x128xf32>
      %37 = vector.shape_cast %34 : vector<1x128xf32> to vector<1x1x128xf32>
      tpu.vector_store %arg4[%c0_18, %c0_19, %c0_20], %37 {strides = array<i32>} : memref<1x1x128xf32, #tpu.memory_space<vmem>>, vector<1x1x128xf32>,
    } else {
    }
    %28 = arith.extui %24 : i1 to i32
    %c0_i32_13 = arith.constant 0 : i32
    %29 = arith.cmpi ne, %28, %c0_i32_13 : i32
    scf.if %29 {
      %30 = tpu.iota {dimensions = array<i32: 0>} : vector<2x128xi32>
      %31 = tpu.iota {dimensions = array<i32: 1>} : vector<2x128xi32>
      %c2_i32_14 = arith.constant 2 : i32
      %32 = arith.muli %21, %c2_i32_14 : i32
      %33 = vector.broadcast %32 : i32 to vector<2x128xi32>
      %34 = arith.addi %33, %30 : vector<2x128xi32>
      %c2_i32_15 = arith.constant 2 : i32
      %35 = vector.broadcast %c2_i32_15 : i32 to vector<2x128xi32>
      %36 = arith.cmpi slt, %34, %35 : vector<2x128xi32>
      %c2_i32_16 = arith.constant 2 : i32
      %37 = vector.broadcast %c2_i32_16 : i32 to vector<2x128xi32>
      %38 = arith.cmpi eq, %34, %37 : vector<2x128xi32>
      %c0_i32_17 = arith.constant 0 : i32
      %39 = vector.broadcast %c0_i32_17 : i32 to vector<2x128xi32>
      %40 = arith.cmpi slt, %31, %39 : vector<2x128xi32>
      %41 = arith.andi %38, %40 : vector<2x128xi1>
      %42 = arith.ori %36, %41 : vector<2x128xi1>
      %cst_18 = arith.constant 0.000000e+00 : f32
      %43 = vector.broadcast %cst_18 : f32 to vector<2x128xf32>
      %44 = arith.select %42, %19, %43 : vector<2x128xi1>, vector<2x128xf32>
      %c0_19 = arith.constant 0 : index
      %c0_20 = arith.constant 0 : index
      %c0_21 = arith.constant 0 : index
      %45 = vector.load %arg4[%c0_19, %c0_20, %c0_21] : memref<1x1x128xf32, #tpu.memory_space<vmem>>, vector<1x1x128xf32>
      %46 = vector.shape_cast %45 : vector<1x1x128xf32> to vector<1x128xf32>
      %cst_22 = arith.constant dense<0.000000e+00> : vector<128xf32>
      %47 = vector.multi_reduction <add>, %44, %cst_22 [0] : vector<2x128xf32> to vector<128xf32>
      %48 = vector.shape_cast %47 : vector<128xf32> to vector<1x128xf32>
      %49 = arith.addf %46, %48 : vector<1x128xf32>
      %c0_23 = arith.constant 0 : index
      %c0_24 = arith.constant 0 : index
      %c0_25 = arith.constant 0 : index
      %50 = vector.load %arg4[%c0_23, %c0_24, %c0_25] : memref<1x1x128xf32, #tpu.memory_space<vmem>>, vector<1x1x128xf32>
      %51 = vector.shape_cast %50 : vector<1x1x128xf32> to vector<1x128xf32>
      %52 = vector.shape_cast %49 : vector<1x128xf32> to vector<1x1x128xf32>
      tpu.vector_store %arg4[%c0_23, %c0_24, %c0_25], %52 {strides = array<i32>} : memref<1x1x128xf32, #tpu.memory_space<vmem>>, vector<1x1x128xf32>,
    } else {
    }
    return
  }
  func.func @transform_0(%arg0: i32, %arg1: i32) -> (i32, i32) {
    %c1_i32 = arith.constant 1 : i32
    %0 = arith.muli %arg0, %c1_i32 : i32
    %1 = arith.addi %0, %arg1 : i32
    %c0_i32 = arith.constant 0 : i32
    %2 = arith.minsi %1, %c0_i32 : i32
    %c0_i32_0 = arith.constant 0 : i32
    %c0_i32_1 = arith.constant 0 : i32
    return %2, %c0_i32_0 : i32, i32
  }
  func.func @transform_1(%arg0: i32, %arg1: i32) -> (i32, i32, i32) {
    %c1_i32 = arith.constant 1 : i32
    %0 = arith.muli %arg0, %c1_i32 : i32
    %1 = arith.addi %0, %arg1 : i32
    %c0_i32 = arith.constant 0 : i32
    %2 = arith.minsi %1, %c0_i32 : i32
    %c0_i32_0 = arith.constant 0 : i32
    %c0_i32_1 = arith.constant 0 : i32
    %c0_i32_2 = arith.constant 0 : i32
    return %c0_i32_0, %2, %c0_i32_1 : i32, i32, i32
  }
  func.func @transform_2(%arg0: i32, %arg1: i32) -> (i32, i32, i32) {
    %c0_i32 = arith.constant 0 : i32
    %c0_i32_0 = arith.constant 0 : i32
    %c0_i32_1 = arith.constant 0 : i32
    return %arg0, %c0_i32, %c0_i32_0 : i32, i32, i32
  }
}

</mosaic_0001>

<bundles_post_ra>
// kernel: tpu_custom_call.1
= control target key start
LH: loop header
LB: loop body
LE: loop exit
PB: predicated region body
PF: predicated region fallthrough
CT: control target
= control target key end

     0   :  { %7 = vsyncpa [#allocation3], 0  ;;  %s279_s0 = inlined_call_operand.hbm [shape: f32[2,128], index: 0, kind: input, shape index: {}]   ;;  %s280_s1 = inlined_call_operand.hbm [shape: f32[2,2,128], index: 1, kind: input, shape index: {}]   ;;  %s281_s2 = inlined_call_operand.hbm [shape: f32[1,1,128], index: 2, kind: output, shape index: {}]  }
   0x1   :  { %8 = vsyncpa [#allocation6], 0 }
   0x2   :  { %9 = vsyncpa [#allocation4], 0  ;;  %s215_s9 = smov [#allocation2]   ;;  %s216_s11 = smov [#allocation5]  }
   0x3   :  { %s21_s10 = sshll.u32 %s215_s9, 4  ;;  %s35_s12 = sshll.u32 %s216_s11, 4  ;;  %s22_s10 = int_to_ptr.vmem [resolvable:$true] %s21_s10  ;;  %s236_s12 = int_to_ptr.vmem [resolvable:$true] %s35_s12 }
   0x4   :  { %s143_s15 = scalar_lea.hbm %s279_s0, 32 }
   0x5   :  { %p144_p0 = scmp.ne.s32.totalorder %s279_s0, %s143_s15  ;;  %p147_p1 = scmp.lt.u32.totalorder %s143_s15, %s279_s0 }
   0x7   :  { %p149_p2 = pnand %p147_p1, %p144_p0 }
   0x9   :  { %152 = shalt.err (!%p149_p2)
}
   0xa   :  { %s153_s20 = scalar_lea.vmem %s22_s10, 32  ;;  %p158_p4 = scmp.lt.s32.totalorder %s22_s10, %s22_s10 }
   0xb   :  { %p154_p3 = scmp.ne.s32.totalorder %s22_s10, %s153_s20  ;;  %p159_p5 = scmp.lt.s32.totalorder %s153_s20, %s153_s20 }
   0xd   :  { %p160_p6 = por %p159_p5, %p158_p4 }
   0xf   :  { %p161_p7 = pnand %p160_p6, %p154_p3 }
  0x11   :  { %164 = shalt.err (!%p161_p7)
}
  0x12   :  { %24 = dma.hbm_to_vmem [thread:$0]  %s279_s0, 32, %s22_s10, [#allocation3]  }
  0x13   :  { %s165_s25 = scalar_lea.hbm %s280_s1, 64 }
  0x14   :  { %p166_p8 = scmp.ne.s32.totalorder %s280_s1, %s165_s25  ;;  %p169_p9 = scmp.lt.u32.totalorder %s165_s25, %s280_s1 }
  0x16   :  { %p171_p10 = pnand %p169_p9, %p166_p8 }
  0x18   :  { %174 = shalt.err (!%p171_p10)
}
  0x19   :  { %s175_s30 = scalar_lea.vmem %s236_s12, 64  ;;  %p180_p12 = scmp.lt.s32.totalorder %s236_s12, %s236_s12 }
  0x1a   :  { %p176_p11 = scmp.ne.s32.totalorder %s236_s12, %s175_s30  ;;  %p181_p13 = scmp.lt.s32.totalorder %s175_s30, %s175_s30 }
  0x1c   :  { %p182_p0 = por %p181_p13, %p180_p12 }
  0x1e   :  { %p183_p1 = pnand %p182_p0, %p176_p11 }
  0x20   :  { %186 = shalt.err (!%p183_p1)
}
  0x21   :  { %s217_s0 = smov 32   ;;  %s218_s3 = smov 2  }
  0x22   :  { %41 = dma.hbm_to_vmem [thread:$0]  %s280_s1, 64, %s236_s12, [#allocation6], %s217_s0, %s217_s0, %s218_s3  }
  0x23   :  { %209 = dma.done.wait [#allocation3], 32  }
  0x24   :  { %210 = vsyncadd [#allocation3], 4294967264 }
  0x25   :  { %211 = dma.done.wait [#allocation6], 64  }
  0x26   :  { %212 = vsyncadd [#allocation6], 4294967232  ;;  %v219_v0 = vmov 0.0   ;;  %v59_v1 = vld [vmem:[#allocation2] sm:$0x3]  ;;  %vm80_vm0 = vcmask 1041408  }
  0x27   :  { %58 = vst [vmem:[#allocation7] sm:$0x1] %v219_v0  ;;  %v60_v2 = vld [vmem:[#allocation5] sm:$0x3]  ;;  %v62_v3 = vld [vmem:[#allocation5 + $0x2] sm:$0x3] }
  0x28   :  { %v63_v4 = vsub.f32 %v60_v2, %v59_v1  ;;  %v66_v5 = vsub.f32 %v59_v1, %v62_v3  ;;  %s220_s1 = smov [#allocation7]  }
  0x29   :  { %s123_s6 = sshll.u32 %s220_s1, 4  ;;  %s124_s6 = int_to_ptr.vmem [resolvable:$true] %s123_s6 }
  0x2a   :  { %v64_v6 = vadd.f32 1.0, %v63_v4  ;;  %v67_v7 = vadd.f32 1.0, %v66_v5  ;;  %s187_s7 = scalar_lea.vmem %s124_s6, 16  ;;  %s191_s8 = scalar_lea.vmem %s124_s6, 32 }
  0x2b   :  { %p188_p2 = scmp.ne.s32.totalorder %s124_s6, %s187_s7  ;;  %p192_p3 = scmp.lt.s32.totalorder %s124_s6, %s124_s6 }
  0x2c   :  { %v65_v8 = vmax.f32 %v64_v6, 0.0  ;;  %v68_v9 = vmax.f32 %v67_v7, 0.0  ;;  %p193_p4 = scmp.lt.s32.totalorder %s191_s8, %s187_s7 }
  0x2e   :  { %v69_v10 = vadd.f32 %v68_v9, %v65_v8  ;;  %v79_v18 = vld [vmem:[#allocation7] sm:$0x1]  ;;  %p194_p5 = por %p193_p4, %p192_p3 }
  0x30   :  { %v70_v11 = vmul.f32 %v69_v10, %v69_v10  ;;  %p195_p6 = pnand %p194_p5, %p188_p2 }
  0x32   :  { %v81_v12 = vsel %vm80_vm0, %v70_v11, 0.0 }
  0x33   :  { %v82_v13 = vrot.slane %v81_v12, 4 }
  0x35   :  { %v83_v14 = vadd.f32 %v82_v13, %v81_v12 }
  0x37   :  { %v84_v15 = vrot.slane %v83_v14, 2 }
  0x39   :  { %v85_v16 = vadd.f32 %v84_v15, %v83_v14 }
  0x3b   :  { %v86_v17 = vrot.slane %v85_v16, 1 }
  0x3d   :  { %v87_v19 = vadd.f32 %v86_v17, %v85_v16 }
  0x3f   :  { %v88_v20 = vadd.f32 %v87_v19, %v79_v18 }
  0x41   :  { %89 = vst [vmem:[#allocation7] sm:$0x1] %v88_v20 }
  0x42   :  { %198 = shalt.err (!%p195_p6)
}
  0x43   :  { %s199_s11 = scalar_lea.hbm %s281_s2, 16 }
  0x44   :  { %p200_p7 = scmp.ne.s32.totalorder %s281_s2, %s199_s11  ;;  %p203_p8 = scmp.lt.u32.totalorder %s199_s11, %s281_s2 }
  0x46   :  { %p205_p9 = pnand %p203_p8, %p200_p7 }
  0x48   :  { %208 = shalt.err (!%p205_p9)
}
  0x49   :  { %126 = dma.vmem_to_hbm [thread:$0]  %s124_s6, 16, %s281_s2, [#allocation4]  }
  0x4a   :  { %213 = dma.done.wait [#allocation4], 16  }
  0x4b   :  { %214 = vsyncadd [#allocation4], 4294967280 }
  0x4c   :  { %130 = vsyncpa [#allocation3], 1 }
  0x4d   :  { %131 = vsyncpa [#allocation6], 1 }
  0x4e   :  { %132 = vsyncpa [#allocation4], 1 }

</bundles_post_ra>
